<compile_context>
chip_gen: v5e
topology: v5e:2x2
jax: 0.10.0
libtpu: 0.0.40
codegen_flags: <defaults>
</compile_context>

<pallas_src>
import functools
import math

import jax
import jax.numpy as jnp
from jax import lax
from jax.experimental import pallas as pl
from jax.experimental.pallas import tpu as pltpu


# ----------------------------- hardware probing -------------------------------

def _vmem_capacity_bytes():
    """Per-core VMEM capacity; conservative 64 MiB fallback (v7x floor)."""
    try:
        info = pltpu.get_tpu_info()
        cap = getattr(info, "vmem_capacity_bytes", None)
        if cap:
            return int(cap)
    except Exception:
        pass
    return 64 * 1024 * 1024


# ----------------------------- shared gate math --------------------------------

def _gate_math(y, wq, bq, wk, bk, wv, bv, wo, bo, *, num_heads):
    """Head-batched MHA over the batch-as-sequence axis + sigmoid, all f32.

    y: (B, E) pooled features (Conv1d already folded into the weights).
    wq/wk/wv: (h, E, d); bq/bk/bv: (h, 1, d); wo: (h, d, E); bo: (1, E).
    """
    B, E = y.shape
    d = E // num_heads
    scale = 1.0 / math.sqrt(d)

    yb = jnp.broadcast_to(y, (num_heads, B, E))            # hoisted once, tiny
    dn_proj = (((2,), (1,)), ((0,), (0,)))                  # (h,B,E) x (h,E,d) -> (h,B,d)
    q = lax.dot_general(yb, wq, dn_proj, preferred_element_type=jnp.float32) + bq
    k = lax.dot_general(yb, wk, dn_proj, preferred_element_type=jnp.float32) + bk
    v = lax.dot_general(yb, wv, dn_proj, preferred_element_type=jnp.float32) + bv

    s = lax.dot_general(q, k, (((2,), (2,)), ((0,), (0,))),
                        preferred_element_type=jnp.float32) * scale   # (h, B, B)
    s = s - jnp.max(s, axis=-1, keepdims=True)
    p = jnp.exp(s)
    p = p * pl.reciprocal(jnp.sum(p, axis=-1, keepdims=True))
    o = lax.dot_general(p, v, (((2,), (1,)), ((0,), (0,))),
                        preferred_element_type=jnp.float32)           # (h, B, d)
    proj = lax.dot_general(o, wo, (((2,), (1,)), ((0,), (0,))),
                           preferred_element_type=jnp.float32)        # (h, B, E)
    # head-concat folded into per-head projections summed over heads
    proj = jnp.sum(proj, axis=0) + bo                                 # (B, E)
    return jax.nn.sigmoid(proj)                                       # f32 gate


# ----------------------------- fused single-kernel path ------------------------

def _fused_kernel(x_ref, wq, bq, wk, bk, wv, bv, wo, bo, o_ref, *, num_heads, inv_hw):
    """x resident in VMEM: pool + gate math + gating multiply in one pass."""
    xf = x_ref[...].astype(jnp.float32)                    # (B, C, HW)
    y = jnp.sum(xf, axis=-1) * inv_hw                      # (B, C)
    gate = _gate_math(y, wq[...], bq[...], wk[...], bk[...], wv[...], bv[...],
                      wo[...], bo[...], num_heads=num_heads)
    o_ref[...] = (xf * gate[:, :, None]).astype(o_ref.dtype)


# ----------------------------- tiled path: pass 1 (pooling) --------------------

def _pool_kernel(x_ref, sum_ref, *, inv_hw):
    """Accumulate the spatial mean of x (rows = B*C, lanes = HW tiles)."""
    j = pl.program_id(1)

    @pl.when(j == 0)
    def _():
        sum_ref[...] = jnp.zeros_like(sum_ref)

    sum_ref[...] += jnp.sum(x_ref[...].astype(jnp.float32), axis=-1, keepdims=True)

    @pl.when(j == pl.num_programs(1) - 1)
    def _():
        sum_ref[...] *= inv_hw


# ----------------------------- tiled path: pass 2 (gate) -----------------------

def _gate_kernel(y_ref, wq, bq, wk, bk, wv, bv, wo, bo, g_ref, *, num_heads):
    g_ref[...] = _gate_math(y_ref[...], wq[...], bq[...], wk[...], bk[...],
                            wv[...], bv[...], wo[...], bo[...], num_heads=num_heads)


# ----------------------------- tiled path: pass 3 (gating) ---------------------

def _apply_gate_kernel(x_ref, g_ref, o_ref):
    """out = x * gate (gate kept f32, product rounded to x.dtype at the store)."""
    o_ref[...] = (x_ref[...].astype(jnp.float32) * g_ref[...]).astype(o_ref.dtype)


# ----------------------------- parameter folding (hoisted) ---------------------

def fold_eca_params(params, num_heads):
    """One-time folding of Conv1d(k=3, pad=1) into the QKV in-projection and
    re-layout of all weights into per-head (h, E, d)/(h, d, E) form."""
    inw = jnp.asarray(params["in_proj_weight"], jnp.float32)      # (3E, E)
    E = inw.shape[1]
    assert E % num_heads == 0
    d = E // num_heads
    cw = jnp.asarray(params["conv_w"], jnp.float32).reshape(3)
    cb = jnp.asarray(params["conv_b"], jnp.float32).reshape(())
    idx = jnp.arange(E)
    conv_mat = (cw[0] * (idx[:, None] == idx[None, :] - 1)        # y3 = y @ conv_mat + cb
                + cw[1] * (idx[:, None] == idx[None, :])
                + cw[2] * (idx[:, None] == idx[None, :] + 1)).astype(jnp.float32)
    in_wT = inw.T                                                  # (E, 3E)
    qkv_wT = conv_mat @ in_wT                                      # (E, 3E)
    qkv_b = (jnp.asarray(params["in_proj_bias"], jnp.float32)
             + cb * jnp.sum(in_wT, axis=0))                        # (3E,)

    def head_split(s):
        w = qkv_wT[:, s * E:(s + 1) * E].reshape(E, num_heads, d).transpose(1, 0, 2)
        b = qkv_b[s * E:(s + 1) * E].reshape(num_heads, 1, d)
        return w, b                                                # (h, E, d), (h, 1, d)

    wq, bq = head_split(0)
    wk, bk = head_split(1)
    wv, bv = head_split(2)
    wo = jnp.asarray(params["out_proj_weight"], jnp.float32).T.reshape(num_heads, d, E)
    bo = jnp.asarray(params["out_proj_bias"], jnp.float32).reshape(1, E)
    return dict(wq=wq, bq=bq, wk=wk, bk=bk, wv=wv, bv=bv, wo=wo, bo=bo)


# ----------------------------- tile selection -----------------------------------

def _pick_tile(dim, unit, max_elems):
    """Largest multiple-of-`unit` divisor of `dim` that is <= max_elems, else full `dim`."""
    if dim <= max_elems:
        return dim
    t = (max_elems // unit) * unit
    while t >= unit:
        if dim % t == 0:
            return t
        t -= unit
    # TODO(synk): awkward (prime-factor) dims fall back to the full dim; a cdiv grid
    # with masked edge tiles would avoid the VMEM-budget cliff in that case.
    return dim


# ----------------------------- wrapper -------------------------------------------

def eca_attention(x, folded, num_heads):
    B, C, H, W = x.shape
    assert C % num_heads == 0, "embed_dim (C) must be divisible by num_heads"
    HW = H * W
    BC = B * C
    itemsize = jnp.dtype(x.dtype).itemsize
    vmem_cap = _vmem_capacity_bytes()
    vmem = pltpu.MemorySpace.VMEM
    weights = (folded["wq"], folded["bq"], folded["wk"], folded["bk"],
               folded["wv"], folded["bv"], folded["wo"], folded["bo"])

    x_bytes = BC * HW * itemsize

    # ---- fused path: x (+ its f32 working copy and the output) stays VMEM-resident ----
    if x_bytes <= vmem_cap // 4:
        out3 = pl.pallas_call(
            functools.partial(_fused_kernel, num_heads=num_heads, inv_hw=1.0 / HW),
            out_shape=jax.ShapeDtypeStruct((B, C, HW), x.dtype),
            in_specs=[pl.BlockSpec(memory_space=vmem)] * 9,
            out_specs=pl.BlockSpec(memory_space=vmem),
            compiler_params=pltpu.CompilerParams(
                vmem_limit_bytes=int(vmem_cap * 0.9)),
            cost_estimate=pl.CostEstimate(flops=3 * BC * HW, transcendentals=BC,
                                          bytes_accessed=2 * x_bytes),
        )(x.reshape(B, C, HW), *weights)
        return out3.reshape(B, C, H, W)

    # ---- tiled 3-pass path: bytes-based, generation-aware, dtype-aware tiles ----
    x2 = x.reshape(BC, HW)                   # NCHW is contiguous -> free reshape
    # ~80 MiB limit / ~8 MiB blocks on 128-MiB parts (v5e/v6e); ~42 MiB / ~4 MiB on v7x.
    vmem_limit = max(32 << 20, min(int(vmem_cap * 0.65), 96 << 20))
    target_block_bytes = max(2 << 20, vmem_limit // 10)
    unit = max(8, 32 // itemsize)            # sublane unit: 8 f32 / 16 bf16 / 32 int8-fp8
    elems_per_block = target_block_bytes // itemsize

    hw_cap = min(8192, max(128, elems_per_block // unit))   # wide lane-dense blocks
    hw_tile = _pick_tile(HW, 128, hw_cap)
    row_budget = max(unit, (elems_per_block // hw_tile) // unit * unit)
    if BC >= 2 * unit:                       # keep >=2 row tiles so megacore can split
        row_budget = min(row_budget, max(unit, (BC // 2) // unit * unit))
    row_tile = _pick_tile(BC, unit, row_budget)
    n_rows, n_hw = BC // row_tile, HW // hw_tile

    # pass 1: spatial mean (reduction axis last, pl.when-managed accumulator output)
    pooled = pl.pallas_call(
        functools.partial(_pool_kernel, inv_hw=1.0 / HW),
        out_shape=jax.ShapeDtypeStruct((BC, 1), jnp.float32),
        grid=(n_rows, n_hw),
        in_specs=[pl.BlockSpec((row_tile, hw_tile), lambda i, j: (i, j))],
        out_specs=pl.BlockSpec((row_tile, 1), lambda i, j: (i, 0)),
        compiler_params=pltpu.CompilerParams(
            dimension_semantics=("parallel", "arbitrary"),
            vmem_limit_bytes=vmem_limit),
        cost_estimate=pl.CostEstimate(flops=BC * HW, transcendentals=0,
                                      bytes_accessed=BC * HW * itemsize + BC * 4),
    )(x2)
    y_mean = pooled.reshape(B, C)

    # pass 2: tiny gate kernel on the pooled (B, C) tensor (f32 gate)
    gate = pl.pallas_call(
        functools.partial(_gate_kernel, num_heads=num_heads),
        out_shape=jax.ShapeDtypeStruct((B, C), jnp.float32),
        in_specs=[pl.BlockSpec(memory_space=vmem)] * 9,
        out_specs=pl.BlockSpec(memory_space=vmem),
    )(y_mean, *weights)

    # pass 3: lane-dense gating multiply, both axes parallel (megacore)
    out2 = pl.pallas_call(
        _apply_gate_kernel,
        out_shape=jax.ShapeDtypeStruct((BC, HW), x.dtype),
        grid=(n_rows, n_hw),
        in_specs=[pl.BlockSpec((row_tile, hw_tile), lambda i, j: (i, j)),
                  pl.BlockSpec((row_tile, 1), lambda i, j: (i, 0))],
        out_specs=pl.BlockSpec((row_tile, hw_tile), lambda i, j: (i, j)),
        compiler_params=pltpu.CompilerParams(
            dimension_semantics=("parallel", "parallel"),
            vmem_limit_bytes=vmem_limit),
        cost_estimate=pl.CostEstimate(flops=BC * HW, transcendentals=0,
                                      bytes_accessed=2 * BC * HW * itemsize + BC * 4),
    )(x2, gate.reshape(BC, 1))
    return out2.reshape(B, C, H, W)


# ----------------------------- pure-JAX reference -------------------------------

def eca_reference(x, params, num_heads):
    """Pure-JAX reference matching the PyTorch forward exactly (no weight folding)."""
    B, C, H, W = x.shape
    E = C
    d = E // num_heads
    y = jnp.mean(x, axis=(2, 3))                                   # (B, C)
    cw = params["conv_w"].reshape(3)
    cb = params["conv_b"].reshape(())
    yp = jnp.pad(y, ((0, 0), (1, 1)))
    y3 = cw[0] * yp[:, :-2] + cw[1] * yp[:, 1:-1] + cw[2] * yp[:, 2:] + cb
    inw = params["in_proj_weight"]
    inb = params["in_proj_bias"]
    q = y3 @ inw[:E].T + inb[:E]
    k = y3 @ inw[E:2 * E].T + inb[E:2 * E]
    v = y3 @ inw[2 * E:].T + inb[2 * E:]
    qh = q.reshape(B, num_heads, d)
    kh = k.reshape(B, num_heads, d)
    vh = v.reshape(B, num_heads, d)
    s = jnp.einsum('ihd,jhd->hij', qh, kh) / math.sqrt(d)
    p = jax.nn.softmax(s, axis=-1)
    o = jnp.einsum('hij,jhd->ihd', p, vh).reshape(B, E)
    attn = o @ params["out_proj_weight"].T + params["out_proj_bias"]
    gate = jax.nn.sigmoid(attn)
    return x * gate[:, :, None, None]


if __name__ == "__main__":
    B, C, H, W = 4, 16, 16, 16        # embed_dim = C = 16, HW = 256 (lane-dense)
    num_heads = 2

    key = jax.random.PRNGKey(0)
    ks = jax.random.split(key, 7)
    x = jax.random.normal(ks[0], (B, C, H, W), jnp.float32)
    params = {
        "conv_w": jax.random.normal(ks[1], (1, 1, 3), jnp.float32) * 0.5,
        "conv_b": jax.random.normal(ks[2], (1,), jnp.float32) * 0.1,
        "in_proj_weight": jax.random.normal(ks[3], (3 * C, C), jnp.float32) / math.sqrt(C),
        "in_proj_bias": jax.random.normal(ks[4], (3 * C,), jnp.float32) * 0.1,
        "out_proj_weight": jax.random.normal(ks[5], (C, C), jnp.float32) / math.sqrt(C),
        "out_proj_bias": jax.random.normal(ks[6], (C,), jnp.float32) * 0.1,
    }

    # Weight folding is hoisted: done once per parameter set, reused every forward.
    folded = jax.tree_util.tree_map(jax.block_until_ready, fold_eca_params(params, num_heads))

    out = jax.block_until_ready(eca_attention(x, folded, num_heads))
    ref = eca_reference(x, params, num_heads)
    assert out.shape == x.shape
    max_err = float(jnp.max(jnp.abs(out - ref)))
    assert jnp.allclose(out, ref, atol=2e-5, rtol=2e-5), max_err
    print("KERNEL_OK")
</pallas_src>

<mosaic_0001>
module attributes {stable_mosaic.version = 11 : i64} {
  func.func @_fused_kernel(%arg0: memref<4x16x256xf32, #tpu.memory_space<vmem>>, %arg1: memref<2x16x8xf32, #tpu.memory_space<vmem>>, %arg2: memref<2x1x8xf32, #tpu.memory_space<vmem>>, %arg3: memref<2x16x8xf32, #tpu.memory_space<vmem>>, %arg4: memref<2x1x8xf32, #tpu.memory_space<vmem>>, %arg5: memref<2x16x8xf32, #tpu.memory_space<vmem>>, %arg6: memref<2x1x8xf32, #tpu.memory_space<vmem>>, %arg7: memref<2x8x16xf32, #tpu.memory_space<vmem>>, %arg8: memref<1x16xf32, #tpu.memory_space<vmem>>, %arg9: memref<4x16x256xf32, #tpu.memory_space<vmem>>) attributes {dimension_semantics = [], scalar_prefetch = 0 : i64, scratch_operands = 0 : i64, tpu.core_type = #tpu.core_type<tc>} {
    %c0 = arith.constant 0 : index
    %c0_0 = arith.constant 0 : index
    %c0_1 = arith.constant 0 : index
    %0 = vector.load %arg0[%c0, %c0_0, %c0_1] : memref<4x16x256xf32, #tpu.memory_space<vmem>>, vector<4x16x256xf32>
    %cst = arith.constant dense<0.000000e+00> : vector<4x16xf32>
    %1 = vector.multi_reduction <add>, %0, %cst [2] : vector<4x16x256xf32> to vector<4x16xf32>
    %cst_2 = arith.constant 3.906250e-03 : f32
    %2 = vector.broadcast %cst_2 : f32 to vector<4x16xf32>
    %3 = arith.mulf %1, %2 : vector<4x16xf32>
    %c0_3 = arith.constant 0 : index
    %c0_4 = arith.constant 0 : index
    %c0_5 = arith.constant 0 : index
    %4 = vector.load %arg1[%c0_3, %c0_4, %c0_5] : memref<2x16x8xf32, #tpu.memory_space<vmem>>, vector<2x16x8xf32>
    %c0_6 = arith.constant 0 : index
    %c0_7 = arith.constant 0 : index
    %c0_8 = arith.constant 0 : index
    %5 = vector.load %arg2[%c0_6, %c0_7, %c0_8] : memref<2x1x8xf32, #tpu.memory_space<vmem>>, vector<2x1x8xf32>
    %c0_9 = arith.constant 0 : index
    %c0_10 = arith.constant 0 : index
    %c0_11 = arith.constant 0 : index
    %6 = vector.load %arg3[%c0_9, %c0_10, %c0_11] : memref<2x16x8xf32, #tpu.memory_space<vmem>>, vector<2x16x8xf32>
    %c0_12 = arith.constant 0 : index
    %c0_13 = arith.constant 0 : index
    %c0_14 = arith.constant 0 : index
    %7 = vector.load %arg4[%c0_12, %c0_13, %c0_14] : memref<2x1x8xf32, #tpu.memory_space<vmem>>, vector<2x1x8xf32>
    %c0_15 = arith.constant 0 : index
    %c0_16 = arith.constant 0 : index
    %c0_17 = arith.constant 0 : index
    %8 = vector.load %arg5[%c0_15, %c0_16, %c0_17] : memref<2x16x8xf32, #tpu.memory_space<vmem>>, vector<2x16x8xf32>
    %c0_18 = arith.constant 0 : index
    %c0_19 = arith.constant 0 : index
    %c0_20 = arith.constant 0 : index
    %9 = vector.load %arg6[%c0_18, %c0_19, %c0_20] : memref<2x1x8xf32, #tpu.memory_space<vmem>>, vector<2x1x8xf32>
    %c0_21 = arith.constant 0 : index
    %c0_22 = arith.constant 0 : index
    %c0_23 = arith.constant 0 : index
    %10 = vector.load %arg7[%c0_21, %c0_22, %c0_23] : memref<2x8x16xf32, #tpu.memory_space<vmem>>, vector<2x8x16xf32>
    %c0_24 = arith.constant 0 : index
    %c0_25 = arith.constant 0 : index
    %11 = vector.load %arg8[%c0_24, %c0_25] : memref<1x16xf32, #tpu.memory_space<vmem>>, vector<1x16xf32>
    %12 = vector.shape_cast %3 : vector<4x16xf32> to vector<1x4x16xf32>
    %13 = vector.broadcast %12 : vector<1x4x16xf32> to vector<2x4x16xf32>
    %cst_26 = arith.constant dense<0.000000e+00> : vector<2x4x8xf32>
    %14 = tpu.matmul %13, %4, %cst_26 {dimension_numbers = #tpu.dot_dimension_numbers<[2], [1], [1], [2], [0, 0, 0, 1, 1, 2], [0], [0]>} : vector<2x4x16xf32>, vector<2x16x8xf32>, vector<2x4x8xf32> -> vector<2x4x8xf32>
    %15 = vector.broadcast %5 : vector<2x1x8xf32> to vector<2x4x8xf32>
    %16 = arith.addf %14, %15 : vector<2x4x8xf32>
    %cst_27 = arith.constant dense<0.000000e+00> : vector<2x4x8xf32>
    %17 = tpu.matmul %13, %6, %cst_27 {dimension_numbers = #tpu.dot_dimension_numbers<[2], [1], [1], [2], [0, 0, 0, 1, 1, 2], [0], [0]>} : vector<2x4x16xf32>, vector<2x16x8xf32>, vector<2x4x8xf32> -> vector<2x4x8xf32>
    %18 = vector.broadcast %7 : vector<2x1x8xf32> to vector<2x4x8xf32>
    %19 = arith.addf %17, %18 : vector<2x4x8xf32>
    %cst_28 = arith.constant dense<0.000000e+00> : vector<2x4x8xf32>
    %20 = tpu.matmul %13, %8, %cst_28 {dimension_numbers = #tpu.dot_dimension_numbers<[2], [1], [1], [2], [0, 0, 0, 1, 1, 2], [0], [0]>} : vector<2x4x16xf32>, vector<2x16x8xf32>, vector<2x4x8xf32> -> vector<2x4x8xf32>
    %21 = vector.broadcast %9 : vector<2x1x8xf32> to vector<2x4x8xf32>
    %22 = arith.addf %20, %21 : vector<2x4x8xf32>
    %cst_29 = arith.constant dense<0.000000e+00> : vector<2x4x4xf32>
    %23 = tpu.matmul %16, %19, %cst_29 {dimension_numbers = #tpu.dot_dimension_numbers<[2], [2], [1], [1], [0, 0, 0, 1, 1, 1], [0], [0]>} : vector<2x4x8xf32>, vector<2x4x8xf32>, vector<2x4x4xf32> -> vector<2x4x4xf32>
    %cst_30 = arith.constant 0.353553385 : f32
    %24 = vector.broadcast %cst_30 : f32 to vector<2x4x4xf32>
    %25 = arith.mulf %23, %24 : vector<2x4x4xf32>
    %cst_31 = arith.constant dense<0xFF800000> : vector<2x4xf32>
    %26 = vector.multi_reduction <maximumf>, %25, %cst_31 [2] : vector<2x4x4xf32> to vector<2x4xf32>
    %27 = vector.shape_cast %26 : vector<2x4xf32> to vector<2x4x1xf32>
    %28 = vector.broadcast %27 : vector<2x4x1xf32> to vector<2x4x4xf32>
    %29 = arith.subf %25, %28 : vector<2x4x4xf32>
    %30 = math.exp %29 : vector<2x4x4xf32>
    %cst_32 = arith.constant dense<0.000000e+00> : vector<2x4xf32>
    %31 = vector.multi_reduction <add>, %30, %cst_32 [2] : vector<2x4x4xf32> to vector<2x4xf32>
    %32 = vector.shape_cast %31 : vector<2x4xf32> to vector<2x4x1xf32>
    %33 = tpu.reciprocal %32 : vector<2x4x1xf32> -> vector<2x4x1xf32>
    %34 = vector.broadcast %33 : vector<2x4x1xf32> to vector<2x4x4xf32>
    %35 = arith.mulf %30, %34 : vector<2x4x4xf32>
    %cst_33 = arith.constant dense<0.000000e+00> : vector<2x4x8xf32>
    %36 = tpu.matmul %35, %22, %cst_33 {dimension_numbers = #tpu.dot_dimension_numbers<[2], [1], [1], [2], [0, 0, 0, 1, 1, 2], [0], [0]>} : vector<2x4x4xf32>, vector<2x4x8xf32>, vector<2x4x8xf32> -> vector<2x4x8xf32>
    %cst_34 = arith.constant dense<0.000000e+00> : vector<2x4x16xf32>
    %37 = tpu.matmul %36, %10, %cst_34 {dimension_numbers = #tpu.dot_dimension_numbers<[2], [1], [1], [2], [0, 0, 0, 1, 1, 2], [0], [0]>} : vector<2x4x8xf32>, vector<2x8x16xf32>, vector<2x4x16xf32> -> vector<2x4x16xf32>
    %cst_35 = arith.constant dense<0.000000e+00> : vector<4x16xf32>
    %38 = vector.multi_reduction <add>, %37, %cst_35 [0] : vector<2x4x16xf32> to vector<4x16xf32>
    %39 = vector.broadcast %11 : vector<1x16xf32> to vector<4x16xf32>
    %40 = arith.addf %38, %39 : vector<4x16xf32>
    %41 = arith.negf %40 : vector<4x16xf32>
    %42 = math.exp %41 : vector<4x16xf32>
    %cst_36 = arith.constant 1.000000e+00 : f32
    %43 = vector.broadcast %cst_36 : f32 to vector<4x16xf32>
    %44 = arith.addf %43, %42 : vector<4x16xf32>
    %45 = arith.divf %43, %44 : vector<4x16xf32>
    %46 = vector.shape_cast %45 : vector<4x16xf32> to vector<4x16x1xf32>
    %47 = vector.broadcast %46 : vector<4x16x1xf32> to vector<4x16x256xf32>
    %48 = arith.mulf %0, %47 : vector<4x16x256xf32>
    %c0_37 = arith.constant 0 : index
    %c0_38 = arith.constant 0 : index
    %c0_39 = arith.constant 0 : index
    %49 = vector.load %arg9[%c0_37, %c0_38, %c0_39] : memref<4x16x256xf32, #tpu.memory_space<vmem>>, vector<4x16x256xf32>
    tpu.vector_store %arg9[%c0_37, %c0_38, %c0_39], %48 {strides = array<i32>} : memref<4x16x256xf32, #tpu.memory_space<vmem>>, vector<4x16x256xf32>,
    return
  }
}

</mosaic_0001>

<bundles_post_ra>
// kernel: tpu_custom_call.1
= control target key start
LH: loop header
LB: loop body
LE: loop exit
PB: predicated region body
PF: predicated region fallthrough
CT: control target
= control target key end

     0   :  { %14 = vsyncpa [#allocation3], 0  ;;  %s971_s0 = inlined_call_operand.vmem [shape: f32[4,16,256], index: 0, kind: input, shape index: {}]   ;;  %s972_s1 = inlined_call_operand.vmem [shape: f32[2,16,8], index: 1, kind: input, shape index: {}]   ;;  %s973_s2 = inlined_call_operand.hbm [shape: f32[2,1,8], index: 2, kind: input, shape index: {}]   ;;  %s974_s3 = inlined_call_operand.vmem [shape: f32[2,16,8], index: 3, kind: input, shape index: {}]   ;;  %s975_s4 = inlined_call_operand.vmem [shape: f32[2,1,8], index: 4, kind: input, shape index: {}]   ;;  %s976_s5 = inlined_call_operand.vmem [shape: f32[2,16,8], index: 5, kind: input, shape index: {}]   ;;  %s977_s6 = inlined_call_operand.vmem [shape: f32[2,1,8], index: 6, kind: input, shape index: {}]   ;;  %s978_s7 = inlined_call_operand.vmem [shape: f32[2,8,16], index: 7, kind: input, shape index: {}]   ;;  %s979_s8 = inlined_call_operand.vmem [shape: f32[1,16], index: 8, kind: input, shape index: {}]   ;;  %s980_s9 = inlined_call_operand.hbm [shape: f32[4,16,256], index: 9, kind: output, shape index: {}]  }
   0x1   :  { %15 = vsyncpa [#allocation4], 0  ;;  %s24_s11 = sshll.u32 %s973_s2, 4  ;;  %s722_s12 = smov [#allocation2]   ;;  %s25_s11 = int_to_ptr.hbm [resolvable:$true] %s24_s11 }
   0x2   :  { %s26_s13 = sshll.u32 %s722_s12, 4  ;;  %s723_s14 = smov 16   ;;  %s27_s13 = int_to_ptr.vmem [resolvable:$true] %s26_s13 }
   0x3   :  { %s724_s15 = smov 1  }
   0x4   :  { %32 = dma.hbm_to_vmem [thread:$0]  %s25_s11, 32, %s27_s13, [#allocation3], %s723_s14, %s723_s14, %s724_s15  }
   0x5   :  { %718 = dma.done.wait [#allocation3], 32  }
   0x6   :  { %719 = vsyncadd [#allocation3], 4294967264  ;;  %v785_v0 = vld [vmem:[%s971_s0 + $0x40] sm:$0xff]  ;;  %v790_v1 = vld [vmem:[%s971_s0 + $0x48] sm:$0xff]  ;;  %v132_v39 = vlaneseq  ;;  %vm137_vm0 = vcmask 130112   ;;  %vm148_vm1 = vcmask 1041409  }
   0x7   :  { %v795_v2 = vld [vmem:[%s971_s0 + $0x20] sm:$0xff]  ;;  %v77_v3 = vadd.f32 %v790_v1, %v785_v0  ;;  %v802_v4 = vld [vmem:[%s971_s0 + $0x28] sm:$0xff]  ;;  %v821_v9 = vld [vmem:[%s971_s0 + $0x50] sm:$0xff]  ;;  %vm150_vm2 = vcmask 1042434   ;;  %vm152_vm3 = vcmask 1043459   ;;  %vm154_vm4 = vcmask 130048  }
   0x8   :  { %v807_v5 = vld [vmem:[%s971_s0] sm:$0xff]  ;;  %v812_v6 = vld [vmem:[%s971_s0 + $0x8] sm:$0xff]  ;;  %v71_v7 = vadd.f32 %v802_v4, %v795_v2  ;;  %v826_v10 = vld [vmem:[%s971_s0 + $0x58] sm:$0xff]  ;;  %v133_v40 = vand.u32 127, %v132_v39  ;;  %vm289_vm5 = vcmask 64512   ;;  %vm397_vm6 = vcmask 1043456  }
   0x9   :  { %v65_v8 = vadd.f32 %v812_v6, %v807_v5  ;;  %78 = vadd.xlane.f32.xlu2 %v77_v3  ;;  %v831_v11 = vld [vmem:[%s971_s0 + $0x30] sm:$0xff]  ;;  %v836_v12 = vld [vmem:[%s971_s0 + $0x38] sm:$0xff]  ;;  %v80_v15 = vadd.f32 %v826_v10, %v821_v9  ;;  %v867_v20 = vld [vmem:[%s971_s0 + $0x60] sm:$0xff]  ;;  %vm344_vm7 = vcmask 27648   ;;  %s610_s16 = sshll.u32 %s980_s9, 4  ;;  %s725_s17 = smov [#allocation5]   ;;  %s611_s16 = int_to_ptr.hbm [resolvable:$true] %s610_s16 }
   0xa   :  { %72 = vadd.xlane.f32.xlu1 %v71_v7  ;;  %v841_v13 = vld [vmem:[%s971_s0 + $0x10] sm:$0xff]  ;;  %v846_v14 = vld [vmem:[%s971_s0 + $0x18] sm:$0xff]  ;;  %v74_v16 = vadd.f32 %v836_v12, %v831_v11  ;;  %v872_v21 = vld [vmem:[%s971_s0 + $0x68] sm:$0xff]  ;;  %v135_v41 = vadd.s32 4294967288, %v133_v40  ;;  %s608_s18 = sshll.u32 %s725_s17, 4  ;;  %s726_s19 = smov 256   ;;  %s609_s18 = int_to_ptr.vmem [resolvable:$true] %s608_s18 }
   0xb   :  { %66 = vadd.xlane.f32.xlu0 %v65_v8  ;;  %v68_v17 = vadd.f32 %v846_v14, %v841_v13  ;;  %v857_v18 = vld [vmem:[%s971_s0 + $0x70] sm:$0xff]  ;;  %v862_v19 = vld [vmem:[%s971_s0 + $0x78] sm:$0xff]  ;;  %v83_v23 = vadd.f32 %v872_v21, %v867_v20  ;;  %v98_v24 = vld [vmem:[%s972_s1 + $0x8] sm:$0xff] }
   0xc   :  { %v86_v22 = vadd.f32 %v862_v19, %v857_v18  ;;  %v100_v25 = vld [vmem:[%s972_s1 + $0x18] sm:$0xff]  ;;  %v104_v26 = vld [vmem:[%s974_s3 + $0x8] sm:$0xff]  ;;  %171 = vmatpush.msra.mxu0 %v98_v24  ;;  %v97_v28 = vld [vmem:[%s972_s1] sm:$0xff] }
   0xd   :  { %191 = vmatpush.msra.mxu1 %v100_v25  ;;  %v106_v27 = vld [vmem:[%s974_s3 + $0x18] sm:$0xff]  ;;  %217 = vmatpush.msra.mxu2 %v104_v26  ;;  %v99_v29 = vld [vmem:[%s972_s1 + $0x10] sm:$0xff]  ;;  %v103_v30 = vld [vmem:[%s974_s3] sm:$0xff] }
   0xe   :  { %237 = vmatpush.msra.mxu3 %v106_v27  ;;  %172 = vmatpush.msra.mxu0 %v97_v28  ;;  %v105_v31 = vld [vmem:[%s974_s3 + $0x10] sm:$0xff]  ;;  %v110_v32 = vld [vmem:[%s976_s5 + $0x8] sm:$0xff]  ;;  %v112_v33 = vld [vmem:[%s976_s5 + $0x18] sm:$0xff] }
   0xf   :  { %192 = vmatpush.msra.mxu1 %v99_v29  ;;  %218 = vmatpush.msra.mxu2 %v103_v30  ;;  %v109_v34 = vld [vmem:[%s976_s5] sm:$0xff]  ;;  %v111_v35 = vld [vmem:[%s976_s5 + $0x10] sm:$0xff] }
  0x10   :  { %238 = vmatpush.msra.mxu3 %v105_v31  ;;  %263 = vmatpush.msrb.mxu0 %v110_v32  ;;  %v653_v24 = vld [vmem:[%s975_s4] ss:$0 sm:$0xff]  ;;  %v654_v25 = vld [vmem:[%s975_s4 + $0x1] ss:$0 sm:$0xff] }
  0x11   :  { %81 = vadd.xlane.f32.xlu2 %v80_v15  ;;  %283 = vmatpush.msrb.mxu1 %v112_v33  ;;  %v655_v26 = vld [vmem:[%s977_s6] ss:$0 sm:$0xff]  ;;  %v656_v27 = vld [vmem:[%s977_s6 + $0x1] ss:$0 sm:$0xff] }
  0x12   :  { %75 = vadd.xlane.f32.xlu1 %v74_v16  ;;  %264 = vmatpush.msrb.mxu0 %v109_v34  ;;  %v651_v28 = vld [vmem:[#allocation2] ss:$0 sm:$0xff]  ;;  %v652_v29 = vld [vmem:[#allocation2 + $0x1] ss:$0 sm:$0xff] }
  0x13   :  { %69 = vadd.xlane.f32.xlu0 %v68_v17  ;;  %284 = vmatpush.msrb.mxu1 %v111_v35 }
  0x1a   :  { %87 = vadd.xlane.f32.xlu1 %v86_v22 }
  0x1b   :  { %84 = vadd.xlane.f32.xlu0 %v83_v23 }
  0x7c   :  { %v79_v36 = vpop.xlane.xlu2 %78 }
  0x7d   :  { %v73_v37 = vpop.xlane.xlu1 %72  ;;  %v93_v49 = vmul.f32 0.00390625, %v79_v36 }
  0x7e   :  { %v67_v38 = vpop.xlane.xlu0 %66  ;;  %v91_v45 = vmul.f32 0.00390625, %v73_v37 }
  0x7f   :  { %v89_v46 = vmul.f32 0.00390625, %v67_v38  ;;  %v142_v55 = vperm.slane %v93_v49, %v133_v40 }
  0x80   :  { %v139_v53 = vperm.slane %v91_v45, %v133_v40 }
  0x81   :  { %v134_v54 = vperm.slane %v89_v46, %v133_v40 }
  0x84   :  { %v82_v42 = vpop.xlane.xlu2 %81 }
  0x85   :  { %v76_v43 = vpop.xlane.xlu1 %75  ;;  %v94_v50 = vmul.f32 0.00390625, %v82_v42 }
  0x86   :  { %v70_v44 = vpop.xlane.xlu0 %69  ;;  %v92_v47 = vmul.f32 0.00390625, %v76_v43 }
  0x87   :  { %v90_v48 = vmul.f32 0.00390625, %v70_v44  ;;  %v143_v56 = vperm.slane %v94_v50, %v135_v41 }
  0x88   :  { %v140_v51 = vperm.slane %v92_v47, %v135_v41 }
  0x89   :  { %v136_v52 = vperm.slane %v90_v48, %v135_v41  ;;  %v144_v63 = vsel %vm137_vm0, %v143_v56, %v142_v55 }
  0x8a   :  { %v141_v57 = vsel %vm137_vm0, %v140_v51, %v139_v53 }
  0x8b   :  { %v138_v58 = vsel %vm137_vm0, %v136_v52, %v134_v54 }
  0x8c   :  { %v149_v3 = vsel %vm148_vm1, %v141_v57, %v138_v58  ;;  %v115_v57 = vld [vmem:[%s978_s7] sm:$0xff]  ;;  %v116_v58 = vld [vmem:[%s978_s7 + $0x8] sm:$0xff]  ;;  %vm493_vm1 = vcmask 125952  }
  0x8d   :  { %v88_v59 = vpop.xlane.xlu1 %87  ;;  %v151_v16 = vsel %vm150_vm2, %v144_v63, %v149_v3 }
  0x8e   :  { %v85_v60 = vpop.xlane.xlu0 %84  ;;  %v96_v61 = vmul.f32 0.00390625, %v88_v59 }
  0x8f   :  { %v95_v62 = vmul.f32 0.00390625, %v85_v60 }
  0x90   :  { %v146_v7 = vperm.slane %v96_v61, %v135_v41 }
  0x91   :  { %v145_v8 = vperm.slane %v95_v62, %v133_v40 }
  0x93   :  { %v147_v15 = vsel %vm137_vm0, %v146_v7, %v145_v8  ;;  %vm393_vm0 = vcmask 31744  }
  0x94   :  { %v153_v17 = vsel %vm152_vm3, %v147_v15, %v151_v16 }
  0x95   :  { %623 = vmatmul.msk.f32.vlgmr.msra.gmra.mxu0 %vm154_vm4, %v153_v17  ;;  %624 = vmatmul.msk.f32.vlgmr.msra.gmra.mxu1 %vm154_vm4, %v153_v17 }
  0x96   :  { %625 = vmatmul.msk.f32.vlgmr.msra.gmra.mxu2 %vm154_vm4, %v153_v17  ;;  %626 = vmatmul.msk.f32.vlgmr.msra.gmra.mxu3 %vm154_vm4, %v153_v17 }
  0x9d   :  { %627 = vmatmul.msk.f32.vlgmr.msrb.gmra.mxu0 %vm154_vm4, %v153_v17  ;;  %628 = vmatmul.msk.f32.vlgmr.msrb.gmra.mxu1 %vm154_vm4, %v153_v17 }
 0x112   :  { %v174_v22 = vpop.f32.mrf.mxu0  ;;  %v194_v23 = vpop.f32.mrf.mxu1 }
 0x113   :  { %v175_v38 = vadd.f32 %v651_v28, %v174_v22  ;;  %v195_v40 = vadd.f32 %v652_v29, %v194_v23 }
 0x119   :  { %v220_v30 = vpop.f32.mrf.mxu2  ;;  %v240_v31 = vpop.f32.mrf.mxu3 }
 0x11a   :  { %v221_v32 = vadd.f32 %v653_v24, %v220_v30  ;;  %v241_v33 = vadd.f32 %v654_v25, %v240_v31  ;;  %v266_v34 = vpop.f32.mrf.mxu0  ;;  %v286_v35 = vpop.f32.mrf.mxu1 }
 0x11b   :  { %v267_v36 = vadd.f32 %v655_v26, %v266_v34  ;;  %v287_v37 = vadd.f32 %v656_v27, %v286_v35 }
 0x11c   :  { %629 = vmatpush.xpose.msk.msrb.mxu2 %vm289_vm5, %v221_v32  ;;  %631 = vmatpush.xpose.msk.msrb.mxu3 %vm289_vm5, %v241_v33 }
 0x11d   :  { %633 = vmatpush.msk.msra.mxu0 %vm397_vm6, %v267_v36  ;;  %635 = vmatpush.msk.msra.mxu1 %vm397_vm6, %v287_v37  ;;  %v522_v37 = vshrl.u32 %v132_v39, 7 }
 0x11f   :  { %630 = vmatmul.msk.f32.vlgmr.msrb.gmra.mxu2 %vm289_vm5, %v175_v38  ;;  %632 = vmatmul.msk.f32.vlgmr.msrb.gmra.mxu3 %vm289_vm5, %v195_v40  ;;  %v529_v38 = vadd.s32 8, %v522_v37 }
 0x120   :  { %465 = vmatpush.msra.mxu2 %v115_v57  ;;  %488 = vmatpush.msra.mxu3 %v116_v58 }
 0x121   :  { %647 = vset.pattern.permute.xlu2 %v522_v37  ;;  %645 = vset.pattern.permute.xlu0 %v522_v37 }
 0x122   :  { %646 = vset.pattern.permute.xlu1 %v529_v38 }
 0x1a2   :  { %v313_v41 = vpop.f32.mrf.mxu2  ;;  %v339_v42 = vpop.f32.mrf.mxu3 }
 0x1a3   :  { %v342_v43 = vmul.f32 0.35355338, %v313_v41  ;;  %v343_v44 = vmul.f32 0.35355338, %v339_v42 }
 0x1a5   :  { %v348_v45 = vsel %vm344_vm7, %v343_v44, -inf  ;;  %v345_v46 = vsel %vm344_vm7, %v342_v43, -inf }
 0x1a6   :  { %349 = vmax.xlane.f32.xlu0 %v348_v45  ;;  %346 = vmax.xlane.f32.xlu2 %v345_v46 }
 0x219   :  { %v350_v47 = vpop.xlane.xlu0 %349  ;;  %v347_v48 = vpop.xlane.xlu2 %346 }
 0x21a   :  { %v352_v49 = vsub.f32 %v343_v44, %v350_v47  ;;  %v351_v50 = vsub.f32 %v342_v43, %v347_v48  ;;  %v657_v43 = vld [vmem:[%s979_s8] ss:$0 sm:$0xff] }
 0x21c   :  { %v355_v51 = vmul.f32 1.442695, %v352_v49  ;;  %v353_v52 = vmul.f32 1.442695, %v351_v50 }
 0x21e   :  { %658 = vpow2.f32 %v355_v51 }
 0x21f   :  { %660 = vpow2.f32 %v353_v52 }
 0x224   :  { %v659_v53 = vpop.eup %658 }
 0x225   :  { %v661_v54 = vpop.eup %660  ;;  %v360_v55 = vsel %vm344_vm7, %v659_v53, 0.0 }
 0x226   :  { %361 = vadd.xlane.f32.xlu2 %v360_v55  ;;  %v357_v56 = vsel %vm344_vm7, %v661_v54, 0.0 }
 0x227   :  { %358 = vadd.xlane.f32.xlu1 %v357_v56 }
 0x299   :  { %v362_v59 = vpop.xlane.xlu2 %361 }
 0x29a   :  { %v359_v60 = vpop.xlane.xlu1 %358  ;;  %662 = vrcp.f32 %v362_v59  ;;  %v388_v15 = vand.u32 2147483648, %v362_v59  ;;  %v386_v22 = vand.u32 2147483647, %v362_v59  ;;  %vm382_vm10 = vweird.f32 %v362_v59 }
 0x29b   :  { %664 = vrcp.f32 %v359_v60  ;;  %v374_v16 = vand.u32 2147483648, %v359_v60  ;;  %v372_v24 = vand.u32 2147483647, %v359_v60  ;;  %vm368_vm11 = vweird.f32 %v359_v60 }
 0x29c   :  { %v389_v27 = vor.u32 1.1754944e-38, %v388_v15  ;;  %vm387_vm14 = vcmp.eq.f32.partialorder %v386_v22, 8.507059e+37 }
 0x29d   :  { %v375_v28 = vor.u32 1.1754944e-38, %v374_v16  ;;  %vm373_vm15 = vcmp.eq.f32.partialorder %v372_v24, 8.507059e+37 }
 0x2a0   :  { %v663_v61 = vpop.eup %662 }
 0x2a1   :  { %v665_v62 = vpop.eup %664  ;;  %v378_v63 = vmul.f32 %v663_v61, %v362_v59  ;;  %vm383_vm8 = vweird.f32 %v663_v61 }
 0x2a2   :  { %v364_v3 = vmul.f32 %v665_v62, %v359_v60  ;;  %vm369_vm9 = vweird.f32 %v665_v62  ;;  %vm384_vm12 = vmor %vm382_vm10, %vm383_vm8 }
 0x2a3   :  { %v379_v7 = vsub.f32 1.0, %v378_v63  ;;  %vm370_vm13 = vmor %vm368_vm11, %vm369_vm9 }
 0x2a4   :  { %v365_v8 = vsub.f32 1.0, %v364_v3 }
 0x2a5   :  { %v380_v17 = vmul.f32 %v663_v61, %v379_v7 }
 0x2a6   :  { %v366_v23 = vmul.f32 %v665_v62, %v365_v8 }
 0x2a7   :  { %v381_v25 = vadd.f32 %v663_v61, %v380_v17 }
 0x2a8   :  { %v367_v26 = vadd.f32 %v665_v62, %v366_v23 }
 0x2a9   :  { %v385_v29 = vsel %vm384_vm12, %v663_v61, %v381_v25 }
 0x2aa   :  { %v371_v30 = vsel %vm370_vm13, %v665_v62, %v367_v26  ;;  %v390_v31 = vsel %vm387_vm14, %v389_v27, %v385_v29 }
 0x2ab   :  { %v376_v32 = vsel %vm373_vm15, %v375_v28, %v371_v30  ;;  %v392_v33 = vmul.f32 %v659_v53, %v390_v31 }
 0x2ac   :  { %v391_v34 = vmul.f32 %v661_v54, %v376_v32 }
 0x2ad   :  { %636 = vmatmul.msk.f32.vlgmr.msra.gmra.mxu1 %vm393_vm0, %v392_v33 }
 0x2ae   :  { %634 = vmatmul.msk.f32.vlgmr.msra.gmra.mxu0 %vm393_vm0, %v391_v34 }
 0x32a   :  { %v444_v35 = vpop.f32.mrf.mxu1 }
 0x32b   :  { %v418_v36 = vpop.f32.mrf.mxu0  ;;  %638 = vmatmul.msk.f32.vlgmr.msra.gmra.mxu3 %vm289_vm5, %v444_v35 }
 0x32c   :  { %637 = vmatmul.msk.f32.vlgmr.msra.gmra.mxu2 %vm289_vm5, %v418_v36 }
 0x3ae   :  { %v490_v40 = vpop.f32.mrf.mxu3 }
 0x3af   :  { %v467_v41 = vpop.f32.mrf.mxu2  ;;  %v495_v42 = vsel %vm493_vm1, %v490_v40, 0.0 }
 0x3b0   :  { %v494_v44 = vsel %vm493_vm1, %v467_v41, 0.0 }
 0x3b1   :  { %v496_v45 = vadd.f32 %v495_v42, %v494_v44 }
 0x3b3   :  { %v500_v46 = vadd.f32 %v657_v43, %v496_v45 }
 0x3b5   :  { %v639_v47 = vmul.f32 -1.442695, %v500_v46 }
 0x3b7   :  { %666 = vpow2.f32 %v639_v47 }
 0x3bd   :  { %v667_v48 = vpop.eup %666 }
 0x3be   :  { %v504_v49 = vadd.f32 1.0, %v667_v48 }
 0x3c0   :  { %668 = vrcp.f32 %v504_v49  ;;  %v516_v52 = vand.u32 2147483648, %v504_v49  ;;  %v514_v54 = vand.u32 2147483647, %v504_v49  ;;  %vm510_vm3 = vweird.f32 %v504_v49 }
 0x3c2   :  { %v517_v56 = vor.u32 1.1754944e-38, %v516_v52  ;;  %vm515_vm5 = vcmp.eq.f32.partialorder %v514_v54, 8.507059e+37 }
 0x3c6   :  { %v669_v39 = vpop.eup %668 }
 0x3c7   :  { %v506_v50 = vmul.f32 %v669_v39, %v504_v49  ;;  %vm511_vm2 = vweird.f32 %v669_v39 }
 0x3c8   :  { %vm512_vm4 = vmor %vm510_vm3, %vm511_vm2 }
 0x3c9   :  { %v507_v51 = vsub.f32 1.0, %v506_v50 }
 0x3cb   :  { %v508_v53 = vmul.f32 %v669_v39, %v507_v51 }
 0x3cd   :  { %v509_v55 = vadd.f32 %v669_v39, %v508_v53 }
 0x3cf   :  { %v513_v57 = vsel %vm512_vm4, %v669_v39, %v509_v55 }
 0x3d0   :  { %v518_v58 = vsel %vm515_vm5, %v517_v56, %v513_v57 }
 0x3d1   :  { %v533_v59 = vperm.slane %v518_v58, 1  ;;  %v520_v60 = vperm.slane %v518_v58, 0  ;;  %v546_v61 = vperm.slane %v518_v58, 2  ;;  %v559_v62 = vperm.slane %v518_v58, 3 }
 0x3d3   :  { %538 = vperm.xlu2 %647, %v533_v59   ;;  %531 = vperm.xlu1 %646, %v520_v60  }
 0x3d4   :  { %525 = vperm.xlu0 %645, %v520_v60  }
 0x3db   :  { %648 = vset.pattern.permute.xlu2 %v529_v38  ;;  %649 = vset.pattern.permute.xlu1 %v522_v37 }
 0x3dc   :  { %650 = vset.pattern.permute.xlu0 %v529_v38 }
 0x3e3   :  { %544 = vperm.xlu2 %648, %v533_v59   ;;  %551 = vperm.xlu1 %649, %v546_v61  }
 0x3e4   :  { %570 = vperm.xlu0 %650, %v559_v62  }
 0x3eb   :  { %557 = vperm.xlu2 %648, %v546_v61   ;;  %564 = vperm.xlu1 %649, %v559_v62  }
 0x42d   :  { %v539_v63 = vpop.permute.xlu2 %538 }
 0x42e   :  { %v576_v3 = vmul.f32 %v539_v63, %v795_v2  ;;  %v577_v7 = vmul.f32 %v539_v63, %v802_v4 }
 0x430   :  { %592 = vst [vmem:[#allocation5 + $0x20] sm:$0xff] %v576_v3 }
 0x431   :  { %593 = vst [vmem:[#allocation5 + $0x28] sm:$0xff] %v577_v7 }
 0x43d   :  { %v545_v8 = vpop.permute.xlu2 %544 }
 0x43e   :  { %v578_v15 = vmul.f32 %v545_v8, %v831_v11  ;;  %v579_v16 = vmul.f32 %v545_v8, %v836_v12 }
 0x440   :  { %594 = vst [vmem:[#allocation5 + $0x30] sm:$0xff] %v578_v15 }
 0x441   :  { %595 = vst [vmem:[#allocation5 + $0x38] sm:$0xff] %v579_v16 }
 0x445   :  { %v558_v17 = vpop.permute.xlu2 %557  ;;  %v532_v22 = vpop.permute.xlu1 %531 }
 0x446   :  { %v582_v23 = vmul.f32 %v558_v17, %v821_v9  ;;  %v583_v24 = vmul.f32 %v558_v17, %v826_v10  ;;  %v574_v25 = vmul.f32 %v532_v22, %v841_v13  ;;  %v526_v2 = vpop.permute.xlu0 %525  ;;  %v575_v4 = vmul.f32 %v532_v22, %v846_v14 }
 0x447   :  { %v572_v26 = vmul.f32 %v526_v2, %v807_v5  ;;  %v573_v11 = vmul.f32 %v526_v2, %v812_v6 }
 0x448   :  { %598 = vst [vmem:[#allocation5 + $0x50] sm:$0xff] %v582_v23 }
 0x449   :  { %599 = vst [vmem:[#allocation5 + $0x58] sm:$0xff] %v583_v24 }
 0x44a   :  { %590 = vst [vmem:[#allocation5 + $0x10] sm:$0xff] %v574_v25 }
 0x44b   :  { %591 = vst [vmem:[#allocation5 + $0x18] sm:$0xff] %v575_v4 }
 0x44c   :  { %588 = vst [vmem:[#allocation5] sm:$0xff] %v572_v26 }
 0x44d   :  { %589 = vst [vmem:[#allocation5 + $0x8] sm:$0xff] %v573_v11 }
 0x455   :  { %v552_v12 = vpop.permute.xlu1 %551 }
 0x456   :  { %v580_v9 = vmul.f32 %v552_v12, %v785_v0  ;;  %v581_v10 = vmul.f32 %v552_v12, %v790_v1  ;;  %v571_v27 = vpop.permute.xlu0 %570 }
 0x457   :  { %v586_v13 = vmul.f32 %v571_v27, %v857_v18  ;;  %v587_v14 = vmul.f32 %v571_v27, %v862_v19 }
 0x458   :  { %596 = vst [vmem:[#allocation5 + $0x40] sm:$0xff] %v580_v9 }
 0x459   :  { %597 = vst [vmem:[#allocation5 + $0x48] sm:$0xff] %v581_v10 }
 0x45a   :  { %602 = vst [vmem:[#allocation5 + $0x70] sm:$0xff] %v586_v13 }
 0x45b   :  { %603 = vst [vmem:[#allocation5 + $0x78] sm:$0xff] %v587_v14 }
 0x45d   :  { %v565_v5 = vpop.permute.xlu1 %564 }
 0x45e   :  { %v584_v0 = vmul.f32 %v565_v5, %v867_v20  ;;  %v585_v1 = vmul.f32 %v565_v5, %v872_v21 }
 0x460   :  { %600 = vst [vmem:[#allocation5 + $0x60] sm:$0xff] %v584_v0 }
 0x461   :  { %601 = vst [vmem:[#allocation5 + $0x68] sm:$0xff] %v585_v1 }
 0x462   :  { %616 = dma.vmem_to_hbm [thread:$0]  %s609_s18, 2048, %s611_s16, [#allocation4], %s726_s19, %s726_s19, %s723_s14  }
 0x463   :  { %720 = dma.done.wait [#allocation4], 2048  }
 0x464   :  { %721 = vsyncadd [#allocation4], 4294965248 }
 0x465   :  { %621 = vsyncpa [#allocation3], 1 }
 0x466   :  { %622 = vsyncpa [#allocation4], 1 }

</bundles_post_ra>
